<compile_context>
chip_gen: v5e
topology: v5e:2x2
jax: 0.10.0
libtpu: 0.0.40
codegen_flags: <defaults>
</compile_context>

<pallas_src>
import jax
import jax.numpy as jnp
from jax import lax
from jax.experimental import pallas as pl
from jax.experimental.pallas import tpu as pltpu


def _negmin_kernel(img_ref, txt_ref, x2_ref, two_inv_x_ref, y2_ref, inv_y_ref,
                   lbl_col_ref, lbl_row_ref, out_ref):
    """Running masked-min of squared anchor->candidate distances.

    The (TM,1) output block is resident across the streamed column axis and is
    used directly as the running-min accumulator.
    """
    j = pl.program_id(1)

    @pl.when(j == 0)
    def _init():
        out_ref[...] = jnp.full(out_ref.shape, jnp.inf, jnp.float32)

    # MXU consumes the raw storage dtype directly (bf16 features run at native
    # rate); normalization is folded into a post-scale of the (TM,TN) result.
    xy = lax.dot_general(img_ref[...], txt_ref[...],
                         dimension_numbers=(((1,), (1,)), ((), ())),
                         preferred_element_type=jnp.float32)          # (TM, TN)

    # Squared distance between the *normalized* rows, algebraically:
    #   d2 = ||x_n||^2 + ||y_n||^2 - 2 (x.y) / (max(||x||,eps) max(||y||,eps))
    # No clamp here: min and clamp-at-zero commute, clamp happens on (TM,1).
    d2 = x2_ref[...] + y2_ref[...] - xy * two_inv_x_ref[...] * inv_y_ref[...]

    # Hard-negative mining: mask out same-label candidates. Padded candidate
    # columns arrive with y2 = +inf, so they can never win the min.
    masked = jnp.where(lbl_col_ref[...] == lbl_row_ref[...], jnp.inf, d2)
    tile_min = jnp.min(masked, axis=1, keepdims=True)                 # (TM, 1)
    out_ref[...] = jnp.minimum(out_ref[...], tile_min)


def _plan_tiles(b_pad, d_pad, itemsize):
    # Streamed candidate (column) tile: moderate, keeps (TM,TN) intermediates small.
    tn = 256 if (b_pad % 256 == 0) else 128
    tn = min(tn, b_pad)
    # Row tile: as large as a conservative, generation-safe VMEM budget allows
    # (TM sets the HBM re-read factor of the streamed negatives). Prefer >= 2
    # row blocks so the "parallel" axis can split across TensorCores (v7x).
    budget = 24 * 1024 * 1024
    tm = 128
    for cand in (2048, 1024, 512, 256, 128):
        if b_pad % cand:
            continue
        if b_pad >= 256 and b_pad // cand < 2:
            continue
        need = 2 * (cand + tn) * d_pad * itemsize + 2 * cand * tn * 4
        if need <= budget:
            tm = cand
            break
    return tm, tn


def triplet_loss(image_features, text_features, labels, margin=0.3):
    """Pallas TPU implementation of TripletLoss.forward. Returns scalar f32 loss."""
    B, D = image_features.shape
    eps = jnp.float32(1e-12)  # F.normalize default eps

    # ---- O(B*D) wrapper-side precompute: norms + positive (diagonal) distances ----
    img32 = image_features.astype(jnp.float32)
    txt32 = text_features.astype(jnp.float32)
    ss_x = jnp.sum(img32 * img32, axis=-1)                   # (B,)
    ss_y = jnp.sum(txt32 * txt32, axis=-1)
    inv_x = 1.0 / jnp.maximum(jnp.sqrt(ss_x), eps)           # 1 / max(||x||, eps)
    inv_y = 1.0 / jnp.maximum(jnp.sqrt(ss_y), eps)
    x2 = ss_x * inv_x * inv_x                                 # ||x_n||^2
    y2 = ss_y * inv_y * inv_y                                 # ||y_n||^2
    diff = img32 * inv_x[:, None] - txt32 * inv_y[:, None]
    pos = jnp.sqrt(jnp.sum(diff * diff, axis=-1))             # (B,) positive distances

    # ---- pad feature and batch axes to (8,128)-aligned, lane-dense tiles ----
    Dp = ((D + 127) // 128) * 128
    Bp = ((B + 127) // 128) * 128
    dpad, bpad = Dp - D, Bp - B

    img_p = jnp.pad(image_features, ((0, bpad), (0, dpad)))
    txt_p = jnp.pad(text_features, ((0, bpad), (0, dpad)))
    x2_col = jnp.pad(x2, (0, bpad)).reshape(Bp, 1)
    two_inv_x_col = jnp.pad(2.0 * inv_x, (0, bpad)).reshape(Bp, 1)
    # Padded candidate columns get y2 = +inf -> can never win the hard-negative min.
    y2_row = jnp.pad(y2, (0, bpad), constant_values=jnp.inf).reshape(1, Bp)
    inv_y_row = jnp.pad(inv_y, (0, bpad)).reshape(1, Bp)
    lbl = labels.astype(jnp.int32)
    lbl_col = jnp.pad(lbl, (0, bpad), constant_values=-1).reshape(Bp, 1)
    lbl_row = jnp.pad(lbl, (0, bpad), constant_values=-1).reshape(1, Bp)

    itemsize = image_features.dtype.itemsize
    TM, TN = _plan_tiles(Bp, Dp, itemsize)
    grid = (Bp // TM, Bp // TN)

    cost = pl.CostEstimate(
        flops=2 * Bp * Bp * Dp,
        transcendentals=0,
        bytes_accessed=(grid[0] + 1) * Bp * Dp * itemsize + 7 * Bp * 4)

    negmin2 = pl.pallas_call(
        _negmin_kernel,
        out_shape=jax.ShapeDtypeStruct((Bp, 1), jnp.float32),
        grid=grid,
        in_specs=[
            pl.BlockSpec((TM, Dp), lambda i, j: (i, 0)),   # anchor rows (resident over j)
            pl.BlockSpec((TN, Dp), lambda i, j: (j, 0)),   # streamed candidate rows
            pl.BlockSpec((TM, 1), lambda i, j: (i, 0)),    # ||x_n||^2
            pl.BlockSpec((TM, 1), lambda i, j: (i, 0)),    # 2 / max(||x||, eps)
            pl.BlockSpec((1, TN), lambda i, j: (0, j)),    # ||y_n||^2 (lane-dense)
            pl.BlockSpec((1, TN), lambda i, j: (0, j)),    # 1 / max(||y||, eps)
            pl.BlockSpec((TM, 1), lambda i, j: (i, 0)),    # anchor labels
            pl.BlockSpec((1, TN), lambda i, j: (0, j)),    # candidate labels
        ],
        out_specs=pl.BlockSpec((TM, 1), lambda i, j: (i, 0)),
        compiler_params=pltpu.CompilerParams(
            dimension_semantics=("parallel", "arbitrary"),
            vmem_limit_bytes=48 * 1024 * 1024),
        cost_estimate=cost,
    )(img_p, txt_p, x2_col, two_inv_x_col, y2_row, inv_y_row, lbl_col, lbl_row)

    # Clamp-at-zero deferred to the (B,1) result; +inf (no valid negative) -> relu = 0.
    neg = jnp.sqrt(jnp.maximum(negmin2[:B, 0], 0.0))
    return jnp.mean(jnp.maximum(pos - neg + jnp.float32(margin), 0.0))


def _reference(image_features, text_features, labels, margin=0.3):
    # Pure-JAX reference mirroring the PyTorch module.
    eps = 1e-12
    img = image_features / jnp.maximum(
        jnp.linalg.norm(image_features, axis=-1, keepdims=True), eps)
    txt = text_features / jnp.maximum(
        jnp.linalg.norm(text_features, axis=-1, keepdims=True), eps)
    diff = img[:, None, :] - txt[None, :, :]
    dist = jnp.sqrt(jnp.maximum(jnp.sum(diff * diff, axis=-1), 0.0))
    pos = jnp.diag(dist)
    mask = labels[:, None] == labels[None, :]
    neg = jnp.min(jnp.where(mask, jnp.inf, dist), axis=1)
    return jnp.mean(jnp.maximum(pos - neg + margin, 0.0))


if __name__ == "__main__":
    key = jax.random.PRNGKey(0)
    k1, k2, k3 = jax.random.split(key, 3)

    B, D = 8, 32
    image_features = jax.random.normal(k1, (B, D), dtype=jnp.float32)
    text_features = jax.random.normal(k2, (B, D), dtype=jnp.float32)
    labels = jax.random.randint(k3, (B,), 0, 4, dtype=jnp.int32)

    loss = triplet_loss(image_features, text_features, labels, margin=0.3)
    loss = jax.block_until_ready(loss)

    ref = _reference(image_features, text_features, labels, margin=0.3)
    assert jnp.allclose(loss, ref, atol=1e-5, rtol=1e-5), (loss, ref)

    print("KERNEL_OK")
</pallas_src>

<mosaic_0001>
module attributes {stable_mosaic.version = 11 : i64} {
  func.func @_negmin_kernel(%arg0: i32, %arg1: i32, %arg2: memref<128x128xf32, #tpu.memory_space<vmem>>, %arg3: memref<128x128xf32, #tpu.memory_space<vmem>>, %arg4: memref<128x1xf32, #tpu.memory_space<vmem>>, %arg5: memref<128x1xf32, #tpu.memory_space<vmem>>, %arg6: memref<1x128xf32, #tpu.memory_space<vmem>>, %arg7: memref<1x128xf32, #tpu.memory_space<vmem>>, %arg8: memref<128x1xi32, #tpu.memory_space<vmem>>, %arg9: memref<1x128xi32, #tpu.memory_space<vmem>>, %arg10: memref<128x1xf32, #tpu.memory_space<vmem>>) attributes {dimension_semantics = [#tpu.dimension_semantics<parallel>, #tpu.dimension_semantics<arbitrary>], iteration_bounds = array<i64: 1, 1>, scalar_prefetch = 0 : i64, scratch_operands = 0 : i64, tpu.core_type = #tpu.core_type<tc>, window_params = [{transform_indices = @transform_0, window_bounds = array<i64: 128, 128>}, {transform_indices = @transform_1, window_bounds = array<i64: 128, 128>}, {transform_indices = @transform_2, window_bounds = array<i64: 128, 1>}, {transform_indices = @transform_3, window_bounds = array<i64: 128, 1>}, {transform_indices = @transform_4, window_bounds = array<i64: 1, 128>}, {transform_indices = @transform_5, window_bounds = array<i64: 1, 128>}, {transform_indices = @transform_6, window_bounds = array<i64: 128, 1>}, {transform_indices = @transform_7, window_bounds = array<i64: 1, 128>}, {transform_indices = @transform_8, window_bounds = array<i64: 128, 1>}]} {
    %c0_i32 = arith.constant 0 : i32
    %0 = arith.cmpi eq, %arg1, %c0_i32 : i32
    %1 = arith.extui %0 : i1 to i32
    %c0_i32_0 = arith.constant 0 : i32
    %2 = arith.cmpi ne, %1, %c0_i32_0 : i32
    scf.if %2 {
      %cst_22 = arith.constant 0x7F800000 : f32
      %30 = vector.broadcast %cst_22 : f32 to vector<128x1xf32>
      %c0_23 = arith.constant 0 : index
      %c0_24 = arith.constant 0 : index
      %31 = vector.load %arg10[%c0_23, %c0_24] : memref<128x1xf32, #tpu.memory_space<vmem>>, vector<128x1xf32>
      tpu.vector_store %arg10[%c0_23, %c0_24], %30 {strides = array<i32>} : memref<128x1xf32, #tpu.memory_space<vmem>>, vector<128x1xf32>,
    } else {
    }
    %c0 = arith.constant 0 : index
    %c0_1 = arith.constant 0 : index
    %3 = vector.load %arg2[%c0, %c0_1] : memref<128x128xf32, #tpu.memory_space<vmem>>, vector<128x128xf32>
    %c0_2 = arith.constant 0 : index
    %c0_3 = arith.constant 0 : index
    %4 = vector.load %arg3[%c0_2, %c0_3] : memref<128x128xf32, #tpu.memory_space<vmem>>, vector<128x128xf32>
    %cst = arith.constant dense<0.000000e+00> : vector<128x128xf32>
    %5 = tpu.matmul %3, %4, %cst {dimension_numbers = #tpu.dot_dimension_numbers<[1], [1], [0], [0], [0, 0, 1, 0], [], []>} : vector<128x128xf32>, vector<128x128xf32>, vector<128x128xf32> -> vector<128x128xf32>
    %c0_4 = arith.constant 0 : index
    %c0_5 = arith.constant 0 : index
    %6 = vector.load %arg4[%c0_4, %c0_5] : memref<128x1xf32, #tpu.memory_space<vmem>>, vector<128x1xf32>
    %c0_6 = arith.constant 0 : index
    %c0_7 = arith.constant 0 : index
    %7 = vector.load %arg6[%c0_6, %c0_7] : memref<1x128xf32, #tpu.memory_space<vmem>>, vector<1x128xf32>
    %8 = vector.broadcast %6 : vector<128x1xf32> to vector<128x128xf32>
    %9 = vector.broadcast %7 : vector<1x128xf32> to vector<128x128xf32>
    %10 = arith.addf %8, %9 : vector<128x128xf32>
    %c0_8 = arith.constant 0 : index
    %c0_9 = arith.constant 0 : index
    %11 = vector.load %arg5[%c0_8, %c0_9] : memref<128x1xf32, #tpu.memory_space<vmem>>, vector<128x1xf32>
    %12 = vector.broadcast %11 : vector<128x1xf32> to vector<128x128xf32>
    %13 = arith.mulf %5, %12 : vector<128x128xf32>
    %c0_10 = arith.constant 0 : index
    %c0_11 = arith.constant 0 : index
    %14 = vector.load %arg7[%c0_10, %c0_11] : memref<1x128xf32, #tpu.memory_space<vmem>>, vector<1x128xf32>
    %15 = vector.broadcast %14 : vector<1x128xf32> to vector<128x128xf32>
    %16 = arith.mulf %13, %15 : vector<128x128xf32>
    %17 = arith.subf %10, %16 : vector<128x128xf32>
    %c0_12 = arith.constant 0 : index
    %c0_13 = arith.constant 0 : index
    %18 = vector.load %arg8[%c0_12, %c0_13] : memref<128x1xi32, #tpu.memory_space<vmem>>, vector<128x1xi32>
    %c0_14 = arith.constant 0 : index
    %c0_15 = arith.constant 0 : index
    %19 = vector.load %arg9[%c0_14, %c0_15] : memref<1x128xi32, #tpu.memory_space<vmem>>, vector<1x128xi32>
    %20 = vector.broadcast %18 : vector<128x1xi32> to vector<128x128xi32>
    %21 = vector.broadcast %19 : vector<1x128xi32> to vector<128x128xi32>
    %22 = arith.cmpi eq, %20, %21 : vector<128x128xi32>
    %cst_16 = arith.constant 0x7F800000 : f32
    %23 = vector.broadcast %cst_16 : f32 to vector<128x128xf32>
    %24 = arith.select %22, %23, %17 : vector<128x128xi1>, vector<128x128xf32>
    %cst_17 = arith.constant dense<0x7F800000> : vector<128xf32>
    %25 = vector.multi_reduction <minimumf>, %24, %cst_17 [1] : vector<128x128xf32> to vector<128xf32>
    %26 = vector.shape_cast %25 : vector<128xf32> to vector<128x1xf32>
    %c0_18 = arith.constant 0 : index
    %c0_19 = arith.constant 0 : index
    %27 = vector.load %arg10[%c0_18, %c0_19] : memref<128x1xf32, #tpu.memory_space<vmem>>, vector<128x1xf32>
    %28 = arith.minimumf %27, %26 : vector<128x1xf32>
    %c0_20 = arith.constant 0 : index
    %c0_21 = arith.constant 0 : index
    %29 = vector.load %arg10[%c0_20, %c0_21] : memref<128x1xf32, #tpu.memory_space<vmem>>, vector<128x1xf32>
    tpu.vector_store %arg10[%c0_20, %c0_21], %28 {strides = array<i32>} : memref<128x1xf32, #tpu.memory_space<vmem>>, vector<128x1xf32>,
    return
  }
  func.func @transform_0(%arg0: i32, %arg1: i32) -> (i32, i32) {
    %c0_i32 = arith.constant 0 : i32
    %c0_i32_0 = arith.constant 0 : i32
    return %arg0, %c0_i32 : i32, i32
  }
  func.func @transform_1(%arg0: i32, %arg1: i32) -> (i32, i32) {
    %c0_i32 = arith.constant 0 : i32
    %c0_i32_0 = arith.constant 0 : i32
    return %arg1, %c0_i32 : i32, i32
  }
  func.func @transform_2(%arg0: i32, %arg1: i32) -> (i32, i32) {
    %c0_i32 = arith.constant 0 : i32
    %c0_i32_0 = arith.constant 0 : i32
    return %arg0, %c0_i32 : i32, i32
  }
  func.func @transform_3(%arg0: i32, %arg1: i32) -> (i32, i32) {
    %c0_i32 = arith.constant 0 : i32
    %c0_i32_0 = arith.constant 0 : i32
    return %arg0, %c0_i32 : i32, i32
  }
  func.func @transform_4(%arg0: i32, %arg1: i32) -> (i32, i32) {
    %c0_i32 = arith.constant 0 : i32
    %c0_i32_0 = arith.constant 0 : i32
    return %c0_i32, %arg1 : i32, i32
  }
  func.func @transform_5(%arg0: i32, %arg1: i32) -> (i32, i32) {
    %c0_i32 = arith.constant 0 : i32
    %c0_i32_0 = arith.constant 0 : i32
    return %c0_i32, %arg1 : i32, i32
  }
  func.func @transform_6(%arg0: i32, %arg1: i32) -> (i32, i32) {
    %c0_i32 = arith.constant 0 : i32
    %c0_i32_0 = arith.constant 0 : i32
    return %arg0, %c0_i32 : i32, i32
  }
  func.func @transform_7(%arg0: i32, %arg1: i32) -> (i32, i32) {
    %c0_i32 = arith.constant 0 : i32
    %c0_i32_0 = arith.constant 0 : i32
    return %c0_i32, %arg1 : i32, i32
  }
  func.func @transform_8(%arg0: i32, %arg1: i32) -> (i32, i32) {
    %c0_i32 = arith.constant 0 : i32
    %c0_i32_0 = arith.constant 0 : i32
    return %arg0, %c0_i32 : i32, i32
  }
}

</mosaic_0001>

<bundles_post_ra>
// kernel: tpu_custom_call.1
= control target key start
LH: loop header
LB: loop body
LE: loop exit
PB: predicated region body
PF: predicated region fallthrough
CT: control target
= control target key end

     0   :  { %v650_v0 = vmov 0   ;;  %vm33_vm6 = vcmask 7168   ;;  %s1272_s2 = inlined_call_operand.vmem [shape: f32[128,1], index: 2, kind: input, shape index: {}]   ;;  %s1273_s1 = inlined_call_operand.vmem [shape: f32[128,128], index: 1, kind: input, shape index: {}]   ;;  %s1274_s4 = inlined_call_operand.vmem [shape: f32[1,128], index: 4, kind: input, shape index: {}]   ;;  %s1275_s3 = inlined_call_operand.vmem [shape: f32[128,1], index: 3, kind: input, shape index: {}]   ;;  %s1276_s7 = inlined_call_operand.vmem [shape: s32[1,128], index: 7, kind: input, shape index: {}]   ;;  %s1277_s0 = inlined_call_operand.vmem [shape: f32[128,128], index: 0, kind: input, shape index: {}]   ;;  %s1278_s5 = inlined_call_operand.vmem [shape: f32[1,128], index: 5, kind: input, shape index: {}]   ;;  %s1279_s6 = inlined_call_operand.vmem [shape: s32[128,1], index: 6, kind: input, shape index: {}]   ;;  %s1280_s8 = inlined_call_operand.vmem [shape: f32[128,1], index: 8, kind: output, shape index: {}]  }
   0x1   :  { %646 = vset.pattern.permute.xlu2 %v650_v0  ;;  %645 = vset.pattern.permute.xlu1 %v650_v0  ;;  %v151_v1 = vld [vmem:[%s1272_s2 + $0x20] sm:$0xff]  ;;  %v149_v2 = vld [vmem:[%s1272_s2 + $0x10] sm:$0xff]  ;;  %v81_v4 = vld [vmem:[%s1273_s1 + $0x78] sm:$0xff] }
   0x2   :  { %v147_v3 = vld [vmem:[%s1272_s2] sm:$0xff]  ;;  %644 = vset.pattern.permute.xlu0 %v650_v0  ;;  %186 = vperm.xlu2 %646, %v151_v1   ;;  %v80_v5 = vld [vmem:[%s1273_s1 + $0x70] sm:$0xff]  ;;  %v152_v6 = vld [vmem:[%s1272_s2 + $0x28] sm:$0xff] }
   0x3   :  { %176 = vperm.xlu1 %645, %v149_v2   ;;  %166 = vperm.xlu0 %644, %v147_v3   ;;  %v150_v7 = vld [vmem:[%s1272_s2 + $0x18] sm:$0xff]  ;;  %v148_v8 = vld [vmem:[%s1272_s2 + $0x8] sm:$0xff]  ;;  %v78_v10 = vld [vmem:[%s1273_s1 + $0x60] sm:$0xff] }
   0x4   :  { %82 = vmatpush.xpose.msra.mxu0 %v81_v4  ;;  %594 = vmatpush.xpose.msra.mxu1 %v81_v4  ;;  %v79_v9 = vld [vmem:[%s1273_s1 + $0x68] sm:$0xff]  ;;  %v155_v11 = vld [vmem:[%s1272_s2 + $0x40] sm:$0xff]  ;;  %v154_v12 = vld [vmem:[%s1272_s2 + $0x38] sm:$0xff] }
   0x5   :  { %595 = vmatpush.xpose.msra.mxu2 %v81_v4  ;;  %596 = vmatpush.xpose.msra.mxu3 %v81_v4  ;;  %v153_v13 = vld [vmem:[%s1272_s2 + $0x30] sm:$0xff]  ;;  %v77_v14 = vld [vmem:[%s1273_s1 + $0x58] sm:$0xff]  ;;  %v156_v18 = vld [vmem:[%s1272_s2 + $0x48] sm:$0xff] }
   0x6   :  { %v76_v15 = vld [vmem:[%s1273_s1 + $0x50] sm:$0xff]  ;;  %v158_v16 = vld [vmem:[%s1272_s2 + $0x58] sm:$0xff]  ;;  %v75_v19 = vld [vmem:[%s1273_s1 + $0x48] sm:$0xff] }
   0x7   :  { %v157_v17 = vld [vmem:[%s1272_s2 + $0x50] sm:$0xff]  ;;  %v74_v20 = vld [vmem:[%s1273_s1 + $0x40] sm:$0xff]  ;;  %v160_v22 = vld [vmem:[%s1272_s2 + $0x68] sm:$0xff] }
   0x8   :  { %83 = vmatpush.xpose.msra.mxu0 %v80_v5  ;;  %597 = vmatpush.xpose.msra.mxu1 %v80_v5  ;;  %v161_v21 = vld [vmem:[%s1272_s2 + $0x70] sm:$0xff]  ;;  %v159_v23 = vld [vmem:[%s1272_s2 + $0x60] sm:$0xff]  ;;  %v73_v24 = vld [vmem:[%s1273_s1 + $0x38] sm:$0xff] }
   0x9   :  { %598 = vmatpush.xpose.msra.mxu2 %v80_v5  ;;  %599 = vmatpush.xpose.msra.mxu3 %v80_v5  ;;  %v72_v25 = vld [vmem:[%s1273_s1 + $0x30] sm:$0xff]  ;;  %v264_v26 = vld [vmem:[%s1275_s3 + $0x8] sm:$0xff]  ;;  %v263_v27 = vld [vmem:[%s1275_s3] sm:$0xff] }
   0xa   :  { %191 = vperm.xlu2 %646, %v152_v6   ;;  %v162_v28 = vld [vmem:[%s1272_s2 + $0x78] sm:$0xff]  ;;  %v71_v29 = vld [vmem:[%s1273_s1 + $0x28] sm:$0xff]  ;;  %v70_v30 = vld [vmem:[%s1273_s1 + $0x20] sm:$0xff] }
   0xb   :  { %181 = vperm.xlu1 %645, %v150_v7   ;;  %171 = vperm.xlu0 %644, %v148_v8   ;;  %v267_v31 = vld [vmem:[%s1275_s3 + $0x20] sm:$0xff]  ;;  %v266_v32 = vld [vmem:[%s1275_s3 + $0x18] sm:$0xff]  ;;  %v265_v33 = vld [vmem:[%s1275_s3 + $0x10] sm:$0xff] }
   0xc   :  { %84 = vmatpush.xpose.msra.mxu0 %v79_v9  ;;  %600 = vmatpush.xpose.msra.mxu1 %v79_v9  ;;  %v69_v34 = vld [vmem:[%s1273_s1 + $0x18] sm:$0xff]  ;;  %v68_v35 = vld [vmem:[%s1273_s1 + $0x10] sm:$0xff]  ;;  %v268_v38 = vld [vmem:[%s1275_s3 + $0x28] sm:$0xff] }
   0xd   :  { %601 = vmatpush.xpose.msra.mxu2 %v79_v9  ;;  %602 = vmatpush.xpose.msra.mxu3 %v79_v9  ;;  %v270_v36 = vld [vmem:[%s1275_s3 + $0x38] sm:$0xff]  ;;  %v269_v37 = vld [vmem:[%s1275_s3 + $0x30] sm:$0xff]  ;;  %v67_v39 = vld [vmem:[%s1273_s1 + $0x8] sm:$0xff] }
   0xe   :  { %v66_v40 = vld [vmem:[%s1273_s1] sm:$0xff]  ;;  %v273_v41 = vld [vmem:[%s1275_s3 + $0x50] sm:$0xff]  ;;  %v272_v46 = vld [vmem:[%s1275_s3 + $0x48] sm:$0xff] }
   0xf   :  { %v50_v42 = vld [vmem:[%s1277_s0] sm:$0xff]  ;;  %v276_v48 = vld [vmem:[%s1275_s3 + $0x68] sm:$0xff]  ;;  %v274_v54 = vld [vmem:[%s1275_s3 + $0x58] sm:$0xff] }
  0x10   :  { %85 = vmatpush.xpose.msra.mxu0 %v78_v10  ;;  %603 = vmatpush.xpose.msra.mxu1 %v78_v10  ;;  %v54_v43 = vld [vmem:[%s1277_s0 + $0x20] sm:$0xff]  ;;  %v51_v49 = vld [vmem:[%s1277_s0 + $0x8] sm:$0xff]  ;;  %v52_v56 = vld [vmem:[%s1277_s0 + $0x10] sm:$0xff] }
  0x11   :  { %604 = vmatpush.xpose.msra.mxu2 %v78_v10  ;;  %605 = vmatpush.xpose.msra.mxu3 %v78_v10  ;;  %v58_v44 = vld [vmem:[%s1277_s0 + $0x40] sm:$0xff]  ;;  %v55_v50 = vld [vmem:[%s1277_s0 + $0x28] sm:$0xff]  ;;  %v56_v57 = vld [vmem:[%s1277_s0 + $0x30] sm:$0xff] }
  0x12   :  { %206 = vperm.xlu2 %646, %v155_v11   ;;  %v62_v45 = vld [vmem:[%s1277_s0 + $0x60] sm:$0xff]  ;;  %v59_v51 = vld [vmem:[%s1277_s0 + $0x48] sm:$0xff]  ;;  %v60_v58 = vld [vmem:[%s1277_s0 + $0x50] sm:$0xff] }
  0x13   :  { %201 = vperm.xlu1 %645, %v154_v12   ;;  %196 = vperm.xlu0 %644, %v153_v13   ;;  %v271_v47 = vld [vmem:[%s1275_s3 + $0x40] sm:$0xff]  ;;  %v63_v52 = vld [vmem:[%s1277_s0 + $0x68] sm:$0xff]  ;;  %v64_v59 = vld [vmem:[%s1277_s0 + $0x70] sm:$0xff] }
  0x14   :  { %86 = vmatpush.xpose.msra.mxu0 %v77_v14  ;;  %606 = vmatpush.xpose.msra.mxu1 %v77_v14  ;;  %v275_v53 = vld [vmem:[%s1275_s3 + $0x60] sm:$0xff]  ;;  %v278_v60 = vld [vmem:[%s1275_s3 + $0x78] sm:$0xff]  ;;  %v277_v61 = vld [vmem:[%s1275_s3 + $0x70] sm:$0xff] }
  0x15   :  { %607 = vmatpush.xpose.msra.mxu2 %v77_v14  ;;  %608 = vmatpush.xpose.msra.mxu3 %v77_v14  ;;  %v411_v55 = vld [vmem:[%s1279_s6] sm:$0xff]  ;;  %v414_v62 = vld [vmem:[%s1279_s6 + $0x18] sm:$0xff]  ;;  %v413_v4 = vld [vmem:[%s1279_s6 + $0x10] sm:$0xff] }
  0x16   :  { %v53_v63 = vld [vmem:[%s1277_s0 + $0x18] sm:$0xff]  ;;  %v898_v3 = vld [vmem:[%s1274_s4] ss:$0 sm:$0xff]  ;;  %v412_v5 = vld [vmem:[%s1279_s6 + $0x8] sm:$0xff] }
  0x17   :  { %v57_v0 = vld [vmem:[%s1277_s0 + $0x38] sm:$0xff]  ;;  %v417_v8 = vld [vmem:[%s1279_s6 + $0x30] sm:$0xff]  ;;  %v416_v9 = vld [vmem:[%s1279_s6 + $0x28] sm:$0xff] }
  0x18   :  { %87 = vmatpush.xpose.msra.mxu0 %v76_v15  ;;  %609 = vmatpush.xpose.msra.mxu1 %v76_v15  ;;  %v61_v1 = vld [vmem:[%s1277_s0 + $0x58] sm:$0xff]  ;;  %v415_v10 = vld [vmem:[%s1279_s6 + $0x20] sm:$0xff]  ;;  %v420_v13 = vld [vmem:[%s1279_s6 + $0x48] sm:$0xff] }
  0x19   :  { %610 = vmatpush.xpose.msra.mxu2 %v76_v15  ;;  %611 = vmatpush.xpose.msra.mxu3 %v76_v15  ;;  %v65_v2 = vld [vmem:[%s1277_s0 + $0x78] sm:$0xff]  ;;  %v419_v14 = vld [vmem:[%s1279_s6 + $0x40] sm:$0xff] }
  0x1a   :  { %221 = vperm.xlu2 %646, %v158_v16   ;;  %v418_v15 = vld [vmem:[%s1279_s6 + $0x38] sm:$0xff] }
  0x1b   :  { %216 = vperm.xlu1 %645, %v157_v17   ;;  %211 = vperm.xlu0 %644, %v156_v18   ;;  %v423_v18 = vld [vmem:[%s1279_s6 + $0x60] sm:$0xff] }
  0x1c   :  { %88 = vmatpush.xpose.msra.mxu0 %v75_v19  ;;  %612 = vmatpush.xpose.msra.mxu1 %v75_v19 }
  0x1d   :  { %613 = vmatpush.xpose.msra.mxu2 %v75_v19  ;;  %614 = vmatpush.xpose.msra.mxu3 %v75_v19  ;;  %v422_v19 = vld [vmem:[%s1279_s6 + $0x58] sm:$0xff] }
  0x20   :  { %89 = vmatpush.xpose.msra.mxu0 %v74_v20  ;;  %615 = vmatpush.xpose.msra.mxu1 %v74_v20 }
  0x21   :  { %616 = vmatpush.xpose.msra.mxu2 %v74_v20  ;;  %617 = vmatpush.xpose.msra.mxu3 %v74_v20  ;;  %v421_v20 = vld [vmem:[%s1279_s6 + $0x50] sm:$0xff] }
  0x22   :  { %236 = vperm.xlu2 %646, %v161_v21  }
  0x23   :  { %231 = vperm.xlu1 %645, %v160_v22   ;;  %226 = vperm.xlu0 %644, %v159_v23  }
  0x24   :  { %90 = vmatpush.xpose.msra.mxu0 %v73_v24  ;;  %618 = vmatpush.xpose.msra.mxu1 %v73_v24 }
  0x25   :  { %619 = vmatpush.xpose.msra.mxu2 %v73_v24  ;;  %620 = vmatpush.xpose.msra.mxu3 %v73_v24 }
  0x28   :  { %91 = vmatpush.xpose.msra.mxu0 %v72_v25  ;;  %621 = vmatpush.xpose.msra.mxu1 %v72_v25 }
  0x29   :  { %622 = vmatpush.xpose.msra.mxu2 %v72_v25  ;;  %623 = vmatpush.xpose.msra.mxu3 %v72_v25 }
  0x2a   :  { %286 = vperm.xlu2 %646, %v264_v26  }
  0x2b   :  { %281 = vperm.xlu1 %645, %v263_v27   ;;  %241 = vperm.xlu0 %644, %v162_v28   ;;  %v426_v27 = vld [vmem:[%s1279_s6 + $0x78] sm:$0xff]  ;;  %v425_v28 = vld [vmem:[%s1279_s6 + $0x70] sm:$0xff] }
  0x2c   :  { %92 = vmatpush.xpose.msra.mxu0 %v71_v29  ;;  %624 = vmatpush.xpose.msra.mxu1 %v71_v29 }
  0x2d   :  { %625 = vmatpush.xpose.msra.mxu2 %v71_v29  ;;  %626 = vmatpush.xpose.msra.mxu3 %v71_v29  ;;  %v424_v29 = vld [vmem:[%s1279_s6 + $0x68] sm:$0xff] }
  0x30   :  { %93 = vmatpush.xpose.msra.mxu0 %v70_v30  ;;  %627 = vmatpush.xpose.msra.mxu1 %v70_v30 }
  0x31   :  { %628 = vmatpush.xpose.msra.mxu2 %v70_v30  ;;  %629 = vmatpush.xpose.msra.mxu3 %v70_v30 }
  0x32   :  { %301 = vperm.xlu2 %646, %v267_v31  }
  0x33   :  { %296 = vperm.xlu1 %645, %v266_v32   ;;  %291 = vperm.xlu0 %644, %v265_v33  }
  0x34   :  { %94 = vmatpush.xpose.msra.mxu0 %v69_v34  ;;  %630 = vmatpush.xpose.msra.mxu1 %v69_v34 }
  0x35   :  { %631 = vmatpush.xpose.msra.mxu2 %v69_v34  ;;  %632 = vmatpush.xpose.msra.mxu3 %v69_v34 }
  0x38   :  { %95 = vmatpush.xpose.msra.mxu0 %v68_v35  ;;  %633 = vmatpush.xpose.msra.mxu1 %v68_v35 }
  0x39   :  { %634 = vmatpush.xpose.msra.mxu2 %v68_v35  ;;  %635 = vmatpush.xpose.msra.mxu3 %v68_v35 }
  0x3a   :  { %316 = vperm.xlu2 %646, %v270_v36  }
  0x3b   :  { %311 = vperm.xlu1 %645, %v269_v37   ;;  %306 = vperm.xlu0 %644, %v268_v38  }
  0x3c   :  { %96 = vmatpush.xpose.msra.mxu0 %v67_v39  ;;  %636 = vmatpush.xpose.msra.mxu1 %v67_v39 }
  0x3d   :  { %637 = vmatpush.xpose.msra.mxu2 %v67_v39  ;;  %638 = vmatpush.xpose.msra.mxu3 %v67_v39 }
  0x40   :  { %97 = vmatpush.xpose.msra.mxu0 %v66_v40  ;;  %639 = vmatpush.xpose.msra.mxu1 %v66_v40 }
  0x41   :  { %640 = vmatpush.xpose.msra.mxu2 %v66_v40  ;;  %641 = vmatpush.xpose.msra.mxu3 %v66_v40 }
  0x42   :  { %331 = vperm.xlu2 %646, %v273_v41  }
  0x43   :  { %98 = vmatmul.f32.vlgmr.msra.gmra.mxu0 %v50_v42  ;;  %110 = vmatmul.f32.vlgmr.msra.gmra.mxu1 %v54_v43 }
  0x44   :  { %122 = vmatmul.f32.vlgmr.msra.gmra.mxu2 %v58_v44  ;;  %134 = vmatmul.f32.vlgmr.msra.gmra.mxu3 %v62_v45 }
  0x45   :  { %326 = vperm.xlu1 %645, %v272_v46   ;;  %321 = vperm.xlu0 %644, %v271_v47  }
  0x4a   :  { %346 = vperm.xlu2 %646, %v276_v48  }
  0x4b   :  { %101 = vmatmul.f32.gmra.mxu0 %v51_v49  ;;  %113 = vmatmul.f32.gmra.mxu1 %v55_v50 }
  0x4c   :  { %125 = vmatmul.f32.gmra.mxu2 %v59_v51  ;;  %137 = vmatmul.f32.gmra.mxu3 %v63_v52 }
  0x4d   :  { %341 = vperm.xlu1 %645, %v275_v53   ;;  %336 = vperm.xlu0 %644, %v274_v54  }
  0x52   :  { %429 = vperm.xlu2 %646, %v411_v55  }
  0x53   :  { %104 = vmatmul.f32.gmra.mxu0 %v52_v56  ;;  %116 = vmatmul.f32.gmra.mxu1 %v56_v57 }
  0x54   :  { %128 = vmatmul.f32.gmra.mxu2 %v60_v58  ;;  %140 = vmatmul.f32.gmra.mxu3 %v64_v59 }
  0x55   :  { %356 = vperm.xlu1 %645, %v278_v60   ;;  %351 = vperm.xlu0 %644, %v277_v61  }
  0x5a   :  { %438 = vperm.xlu2 %646, %v414_v62  }
  0x5b   :  { %107 = vmatmul.f32.gmra.mxu0 %v53_v63  ;;  %119 = vmatmul.f32.gmra.mxu1 %v57_v0 }
  0x5c   :  { %131 = vmatmul.f32.gmra.mxu2 %v61_v1  ;;  %143 = vmatmul.f32.gmra.mxu3 %v65_v2  ;;  %v187_v6 = vpop.permute.xlu2 %186  ;;  %v1004_v2 = vld [vmem:[%s1278_s5] ss:$0 sm:$0xff] }
  0x5d   :  { %435 = vperm.xlu1 %645, %v413_v4   ;;  %432 = vperm.xlu0 %644, %v412_v5   ;;  %v907_v7 = vadd.f32 %v898_v3, %v187_v6 }
  0x62   :  { %447 = vperm.xlu2 %646, %v417_v8  }
  0x64   :  { %v192_v11 = vpop.permute.xlu2 %191 }
  0x65   :  { %444 = vperm.xlu1 %645, %v416_v9   ;;  %441 = vperm.xlu0 %644, %v415_v10   ;;  %v919_v12 = vadd.f32 %v898_v3, %v192_v11  ;;  %v1009_v9 = vld [vmem:[%s1276_s7] ss:$0 sm:$0xff] }
  0x6a   :  { %456 = vperm.xlu2 %646, %v420_v13  }
  0x6c   :  { %v207_v16 = vpop.permute.xlu2 %206 }
  0x6d   :  { %453 = vperm.xlu1 %645, %v419_v14   ;;  %450 = vperm.xlu0 %644, %v418_v15   ;;  %v931_v17 = vadd.f32 %v898_v3, %v207_v16 }
  0x72   :  { %465 = vperm.xlu2 %646, %v423_v18  }
  0x74   :  { %v222_v21 = vpop.permute.xlu2 %221 }
  0x75   :  { %462 = vperm.xlu1 %645, %v422_v19   ;;  %459 = vperm.xlu0 %644, %v421_v20   ;;  %v943_v22 = vadd.f32 %v898_v3, %v222_v21  ;;  %v177_v23 = vpop.permute.xlu1 %176  ;;  %v167_v24 = vpop.permute.xlu0 %166 }
  0x76   :  { %v946_v25 = vadd.f32 %v898_v3, %v177_v23  ;;  %v247_v26 = vadd.f32 %v898_v3, %v167_v24 }
  0x7a   :  { %474 = vperm.xlu2 %646, %v426_v27  }
  0x7c   :  { %v237_v30 = vpop.permute.xlu2 %236 }
  0x7d   :  { %471 = vperm.xlu1 %645, %v425_v28   ;;  %468 = vperm.xlu0 %644, %v424_v29   ;;  %v959_v31 = vadd.f32 %v898_v3, %v237_v30  ;;  %v182_v32 = vpop.permute.xlu1 %181  ;;  %v172_v33 = vpop.permute.xlu0 %171 }
  0x7e   :  { %v962_v34 = vadd.f32 %v898_v3, %v182_v32  ;;  %v965_v35 = vadd.f32 %v898_v3, %v172_v33 }
  0x84   :  { %v287_v36 = vpop.permute.xlu2 %286 }
  0x85   :  { %v202_v37 = vpop.permute.xlu1 %201  ;;  %v197_v38 = vpop.permute.xlu0 %196 }
  0x86   :  { %v968_v39 = vadd.f32 %v898_v3, %v202_v37  ;;  %v971_v40 = vadd.f32 %v898_v3, %v197_v38 }
  0x8c   :  { %v302_v41 = vpop.permute.xlu2 %301 }
  0x8d   :  { %v217_v42 = vpop.permute.xlu1 %216  ;;  %v212_v43 = vpop.permute.xlu0 %211 }
  0x8e   :  { %v974_v44 = vadd.f32 %v898_v3, %v217_v42  ;;  %v977_v45 = vadd.f32 %v898_v3, %v212_v43 }
  0x94   :  { %v979_v46 = vpop.permute.xlu2 %316 }
  0x95   :  { %v232_v47 = vpop.permute.xlu1 %231  ;;  %v227_v48 = vpop.permute.xlu0 %226 }
  0x96   :  { %v982_v49 = vadd.f32 %v898_v3, %v232_v47  ;;  %v259_v29 = vadd.f32 %v898_v3, %v227_v48 }
  0x9c   :  { %v984_v50 = vpop.permute.xlu2 %331 }
  0x9d   :  { %v282_v51 = vpop.permute.xlu1 %281  ;;  %v242_v52 = vpop.permute.xlu0 %241 }
  0x9e   :  { %v987_v53 = vadd.f32 %v898_v3, %v242_v52 }
  0xa4   :  { %v347_v54 = vpop.permute.xlu2 %346 }
  0xa5   :  { %v989_v55 = vpop.permute.xlu1 %296  ;;  %v292_v56 = vpop.permute.xlu0 %291 }
  0xac   :  { %v430_v57 = vpop.permute.xlu2 %429 }
  0xad   :  { %v991_v58 = vpop.permute.xlu1 %311  ;;  %v993_v59 = vpop.permute.xlu0 %306  ;;  %vm477_vm0 = vcmp.eq.s32.totalorder %v430_v57, %v1009_v9 }
  0xb4   :  { %v995_v60 = vpop.permute.xlu2 %438 }
  0xb5   :  { %vm480_vm10 = vcmp.eq.s32.totalorder %v995_v60, %v1009_v9 }
  0xb7   :  { %v327_v61 = vpop.permute.xlu1 %326  ;;  %v322_v62 = vpop.permute.xlu0 %321 }
  0xbc   :  { %v997_v63 = vpop.permute.xlu2 %447 }
  0xbd   :  { %vm483_vm7 = vcmp.eq.s32.totalorder %v997_v63, %v1009_v9 }
  0xbf   :  { %v342_v0 = vpop.permute.xlu1 %341  ;;  %v999_v1 = vpop.permute.xlu0 %336 }
  0xc0   :  { %v99_v4 = vpop.f32.mrf.mxu0  ;;  %v111_v5 = vpop.f32.mrf.mxu1 }
  0xc1   :  { %v359_v6 = vmul.f32 %v282_v51, %v99_v4  ;;  %v363_v8 = vmul.f32 %v302_v41, %v111_v5 }
  0xc3   :  { %v379_v10 = vmul.f32 %v1004_v2, %v359_v6  ;;  %v383_v11 = vmul.f32 %v1004_v2, %v363_v8 }
  0xc4   :  { %v457_v13 = vpop.permute.xlu2 %456 }
  0xc5   :  { %v395_v14 = vsub.f32 %v247_v26, %v379_v10  ;;  %v399_v15 = vsub.f32 %v907_v7, %v383_v11  ;;  %vm486_vm2 = vcmp.eq.s32.totalorder %v457_v13, %v1009_v9 }
  0xc7   :  { %v1015_v16 = vpop.permute.xlu1 %356  ;;  %v1017_v18 = vpop.permute.xlu0 %351  ;;  %v493_v19 = vsel %vm477_vm0, inf, %v395_v14 }
  0xc8   :  { %v123_v20 = vpop.f32.mrf.mxu2  ;;  %v135_v21 = vpop.f32.mrf.mxu3  ;;  %509 = vmin.xlane.f32.xlu0 %v493_v19 }
  0xc9   :  { %v371_v23 = vmul.f32 %v342_v0, %v135_v21  ;;  %v1019_v24 = vpop.f32.mrf.mxu1  ;;  %v102_v27 = vpop.f32.mrf.mxu0  ;;  %v367_v5 = vmul.f32 %v322_v62, %v123_v20 }
  0xca   :  { %v360_v28 = vmul.f32 %v287_v36, %v102_v27 }
  0xcb   :  { %v391_v26 = vmul.f32 %v1004_v2, %v371_v23  ;;  %v387_v62 = vmul.f32 %v1004_v2, %v367_v5 }
  0xcc   :  { %v1024_v7 = vmul.f32 %v1004_v2, %v360_v28  ;;  %v466_v30 = vpop.permute.xlu2 %465 }
  0xcd   :  { %vm489_vm1 = vcmp.eq.s32.totalorder %v466_v30, %v1009_v9  ;;  %v407_v32 = vsub.f32 %v259_v29, %v391_v26 }
  0xce   :  { %v396_v33 = vsub.f32 %v965_v35, %v1024_v7 }
  0xcf   :  { %v436_v37 = vpop.permute.xlu1 %435  ;;  %v1029_v38 = vpop.permute.xlu0 %432  ;;  %v505_v41 = vsel %vm489_vm1, inf, %v407_v32 }
  0xd0   :  { %v126_v42 = vpop.f32.mrf.mxu2  ;;  %v138_v36 = vpop.f32.mrf.mxu3  ;;  %533 = vmin.xlane.f32.xlu2 %v505_v41  ;;  %vm479_vm4 = vcmp.eq.s32.totalorder %v436_v37, %v1009_v9  ;;  %v651_v37 = vmov inf   ;;  %vm478_vm8 = vcmp.eq.s32.totalorder %v1029_v38, %v1009_v9 }
  0xd1   :  { %v368_v3 = vmul.f32 %v327_v61, %v126_v42  ;;  %v372_v43 = vmul.f32 %v347_v54, %v138_v36  ;;  %v105_v47 = vpop.f32.mrf.mxu0  ;;  %v117_v48 = vpop.f32.mrf.mxu1  ;;  %34 = vst.msk [vmem:[%s1280_s8] sm:$0xff] %vm33_vm6, %v651_v37 }
  0xd2   :  { %v361_v57 = vmul.f32 %v292_v56, %v105_v47  ;;  %v365_v20 = vmul.f32 %v991_v58, %v117_v48  ;;  %35 = vst.msk [vmem:[%s1280_s8 + $0x8] sm:$0xff] %vm33_vm6, %v651_v37 }
  0xd3   :  { %v388_v51 = vmul.f32 %v1004_v2, %v368_v3  ;;  %v1033_v52 = vmul.f32 %v1004_v2, %v372_v43  ;;  %36 = vst.msk [vmem:[%s1280_s8 + $0x10] sm:$0xff] %vm33_vm6, %v651_v37 }
  0xd4   :  { %v381_v6 = vmul.f32 %v1004_v2, %v361_v57  ;;  %v385_v58 = vmul.f32 %v1004_v2, %v365_v20  ;;  %37 = vst.msk [vmem:[%s1280_s8 + $0x18] sm:$0xff] %vm33_vm6, %v651_v37 }
  0xd5   :  { %v404_v0 = vsub.f32 %v977_v45, %v388_v51  ;;  %v408_v4 = vsub.f32 %v982_v49, %v1033_v52  ;;  %38 = vst.msk [vmem:[%s1280_s8 + $0x20] sm:$0xff] %vm33_vm6, %v651_v37 }
  0xd6   :  { %v397_v23 = vsub.f32 %v946_v25, %v381_v6  ;;  %v403_v25 = vsub.f32 %v931_v17, %v387_v62  ;;  %v364_v17 = vmul.f32 %v993_v59, %v1019_v24  ;;  %39 = vst.msk [vmem:[%s1280_s8 + $0x28] sm:$0xff] %vm33_vm6, %v651_v37  ;;  %v494_v59 = vsel %vm478_vm8, inf, %v396_v33 }
  0xd7   :  { %v1040_v61 = vpop.permute.xlu1 %444  ;;  %v442_v54 = vpop.permute.xlu0 %441  ;;  %v502_v8 = vsel %vm486_vm2, inf, %v404_v0  ;;  %40 = vst.msk [vmem:[%s1280_s8 + $0x30] sm:$0xff] %vm33_vm6, %v651_v37 }
  0xd8   :  { %vm481_vm3 = vcmp.eq.s32.totalorder %v442_v54, %v1009_v9  ;;  %v129_v10 = vpop.f32.mrf.mxu2  ;;  %527 = vmin.xlane.f32.xlu2 %v502_v8  ;;  %v495_v30 = vsel %vm479_vm4, inf, %v397_v23  ;;  %41 = vst.msk [vmem:[%s1280_s8 + $0x38] sm:$0xff] %vm33_vm6, %v651_v37  ;;  %v384_v24 = vmul.f32 %v1004_v2, %v364_v17  ;;  %vm482_vm11 = vcmp.eq.s32.totalorder %v1040_v61, %v1009_v9 }
  0xd9   :  { %v369_v56 = vmul.f32 %v984_v50, %v129_v10  ;;  %v108_v11 = vpop.f32.mrf.mxu0  ;;  %v120_v45 = vpop.f32.mrf.mxu1  ;;  %v497_v14 = vsel %vm481_vm3, inf, %v399_v15  ;;  %42 = vst.msk [vmem:[%s1280_s8 + $0x40] sm:$0xff] %vm33_vm6, %v651_v37  ;;  %v542_v23 = vld [vmem:[%s1280_s8 + $0x8] sm:$0xff] }
  0xda   :  { %v362_v19 = vmul.f32 %v989_v55, %v108_v11  ;;  %v366_v13 = vmul.f32 %v979_v46, %v120_v45  ;;  %517 = vmin.xlane.f32.xlu0 %v497_v14  ;;  %v1054_v55 = vpop.f32.mrf.mxu3  ;;  %43 = vst.msk [vmem:[%s1280_s8 + $0x48] sm:$0xff] %vm33_vm6, %v651_v37  ;;  %v400_v33 = vsub.f32 %v919_v12, %v384_v24  ;;  %v475_v12 = vpop.permute.xlu2 %474  ;;  %v543_v11 = vld [vmem:[%s1280_s8 + $0x10] sm:$0xff] }
  0xdb   :  { %v389_v21 = vmul.f32 %v1004_v2, %v369_v56  ;;  %44 = vst.msk [vmem:[%s1280_s8 + $0x50] sm:$0xff] %vm33_vm6, %v651_v37  ;;  %vm492_vm13 = vcmp.eq.s32.totalorder %v475_v12, %v1009_v9  ;;  %v373_v47 = vmul.f32 %v1017_v18, %v1054_v55 }
  0xdc   :  { %v382_v27 = vmul.f32 %v1004_v2, %v362_v19  ;;  %v386_v50 = vmul.f32 %v1004_v2, %v366_v13  ;;  %45 = vst.msk [vmem:[%s1280_s8 + $0x58] sm:$0xff] %vm33_vm6, %v651_v37  ;;  %v498_v36 = vsel %vm482_vm11, inf, %v400_v33 }
  0xdd   :  { %v405_v28 = vsub.f32 %v974_v44, %v389_v21  ;;  %v401_v44 = vsub.f32 %v971_v40, %v385_v58  ;;  %46 = vst.msk [vmem:[%s1280_s8 + $0x60] sm:$0xff] %vm33_vm6, %v651_v37  ;;  %v544_v58 = vld [vmem:[%s1280_s8 + $0x18] sm:$0xff] }
  0xde   :  { %v402_v46 = vsub.f32 %v968_v39, %v386_v50  ;;  %v398_v15 = vsub.f32 %v962_v34, %v382_v27  ;;  %47 = vst.msk [vmem:[%s1280_s8 + $0x68] sm:$0xff] %vm33_vm6, %v651_v37  ;;  %v547_v20 = vld [vmem:[%s1280_s8 + $0x30] sm:$0xff] }
  0xdf   :  { %v454_v29 = vpop.permute.xlu1 %453  ;;  %v451_v26 = vpop.permute.xlu0 %450  ;;  %v499_v39 = vsel %vm483_vm7, inf, %v401_v44  ;;  %48 = vst.msk [vmem:[%s1280_s8 + $0x70] sm:$0xff] %vm33_vm6, %v651_v37 }
  0xe0   :  { %vm485_vm5 = vcmp.eq.s32.totalorder %v454_v29, %v1009_v9  ;;  %513 = vmin.xlane.f32.xlu2 %v495_v30  ;;  %v132_v35 = vpop.f32.mrf.mxu2  ;;  %vm484_vm12 = vcmp.eq.s32.totalorder %v451_v26, %v1009_v9  ;;  %v496_v41 = vsel %vm480_vm10, inf, %v398_v15  ;;  %49 = vst.msk [vmem:[%s1280_s8 + $0x78] sm:$0xff] %vm33_vm6, %v651_v37  ;;  %v549_v45 = vld [vmem:[%s1280_s8 + $0x40] sm:$0xff]  ;;  %v548_v29 = vld [vmem:[%s1280_s8 + $0x38] sm:$0xff]  ;;  %v546_v26 = vld [vmem:[%s1280_s8 + $0x28] sm:$0xff] }
  0xe1   :  { %v501_v32 = vsel %vm485_vm5, inf, %v403_v25  ;;  %v500_v42 = vsel %vm484_vm12, inf, %v402_v46 }
  0xe2   :  { %525 = vmin.xlane.f32.xlu1 %v501_v32  ;;  %v144_v40 = vpop.f32.mrf.mxu3  ;;  %v551_v21 = vld [vmem:[%s1280_s8 + $0x50] sm:$0xff] }
  0xe3   :  { %v374_v38 = vmul.f32 %v1015_v16, %v144_v40  ;;  %v370_v16 = vmul.f32 %v999_v1, %v132_v35  ;;  %v552_v40 = vld [vmem:[%s1280_s8 + $0x58] sm:$0xff] }
  0xe4   :  { %v553_v49 = vld [vmem:[%s1280_s8 + $0x60] sm:$0xff] }
  0xe5   :  { %v394_v7 = vmul.f32 %v1004_v2, %v374_v38  ;;  %v390_v1 = vmul.f32 %v1004_v2, %v370_v16 }
  0xe7   :  { %v460_v34 = vpop.permute.xlu0 %459  ;;  %v463_v60 = vpop.permute.xlu1 %462  ;;  %v410_v43 = vsub.f32 %v987_v53, %v394_v7  ;;  %v406_v48 = vsub.f32 %v943_v22, %v390_v1  ;;  %v393_v53 = vmul.f32 %v1004_v2, %v373_v47  ;;  %v541_v22 = vld [vmem:[%s1280_s8] sm:$0xff]  ;;  %v555_v7 = vld [vmem:[%s1280_s8 + $0x70] sm:$0xff] }
  0xe8   :  { %vm487_vm9 = vcmp.eq.s32.totalorder %v460_v34, %v1009_v9  ;;  %521 = vmin.xlane.f32.xlu2 %v499_v39  ;;  %vm488_vm14 = vcmp.eq.s32.totalorder %v463_v60, %v1009_v9  ;;  %v556_v34 = vld [vmem:[%s1280_s8 + $0x78] sm:$0xff]  ;;  %v554_v39 = vld [vmem:[%s1280_s8 + $0x68] sm:$0xff] }
  0xe9   :  { %v503_v63 = vsel %vm487_vm9, inf, %v405_v28  ;;  %v508_v51 = vsel %vm492_vm13, inf, %v410_v43  ;;  %v504_v0 = vsel %vm488_vm14, inf, %v406_v48  ;;  %v409_v6 = vsub.f32 %v959_v31, %v393_v53  ;;  %v550_v31 = vld [vmem:[%s1280_s8 + $0x48] sm:$0xff] }
  0xea   :  { %529 = vmin.xlane.f32.xlu0 %v503_v63  ;;  %511 = vmin.xlane.f32.xlu1 %v494_v59 }
  0xef   :  { %v469_v3 = vpop.permute.xlu0 %468  ;;  %v472_v5 = vpop.permute.xlu1 %471 }
  0xf0   :  { %515 = vmin.xlane.f32.xlu2 %v496_v41  ;;  %vm490_vm15 = vcmp.eq.s32.totalorder %v469_v3, %v1009_v9  ;;  %vm491_vm0 = vcmp.eq.s32.totalorder %v472_v5, %v1009_v9 }
  0xf1   :  { %v506_v57 = vsel %vm490_vm15, inf, %v408_v4  ;;  %v507_v61 = vsel %vm491_vm0, inf, %v409_v6  ;;  %v545_v4 = vld [vmem:[%s1280_s8 + $0x20] sm:$0xff] }
  0xf2   :  { %523 = vmin.xlane.f32.xlu0 %v500_v42  ;;  %519 = vmin.xlane.f32.xlu1 %v498_v36 }
  0xf8   :  { %539 = vmin.xlane.f32.xlu2 %v508_v51 }
  0xfa   :  { %535 = vmin.xlane.f32.xlu0 %v506_v57  ;;  %531 = vmin.xlane.f32.xlu1 %v504_v0 }
 0x102   :  { %537 = vmin.xlane.f32.xlu1 %v507_v61 }
 0x13b   :  { %v510_v18 = vpop.xlane.xlu0 %509 }
 0x13c   :  { %v557_v54 = vmin.f32 %v541_v22, %v510_v18 }
 0x13e   :  { %574 = vst.msk [vmem:[%s1280_s8] sm:$0xff] %vm33_vm6, %v557_v54 }
 0x143   :  { %v534_v2 = vpop.xlane.xlu2 %533 }
 0x144   :  { %v569_v9 = vmin.f32 %v553_v49, %v534_v2 }
 0x146   :  { %586 = vst.msk [vmem:[%s1280_s8 + $0x60] sm:$0xff] %vm33_vm6, %v569_v9 }
 0x14b   :  { %v528_v52 = vpop.xlane.xlu2 %527 }
 0x14c   :  { %v566_v8 = vmin.f32 %v550_v31, %v528_v52 }
 0x14d   :  { %v518_v10 = vpop.xlane.xlu0 %517 }
 0x14e   :  { %583 = vst.msk [vmem:[%s1280_s8 + $0x48] sm:$0xff] %vm33_vm6, %v566_v8  ;;  %v561_v56 = vmin.f32 %v545_v4, %v518_v10 }
 0x150   :  { %578 = vst.msk [vmem:[%s1280_s8 + $0x20] sm:$0xff] %vm33_vm6, %v561_v56 }
 0x153   :  { %v514_v14 = vpop.xlane.xlu2 %513 }
 0x154   :  { %v559_v19 = vmin.f32 %v543_v11, %v514_v14 }
 0x155   :  { %v526_v13 = vpop.xlane.xlu1 %525 }
 0x156   :  { %v565_v62 = vmin.f32 %v549_v45, %v526_v13  ;;  %576 = vst.msk [vmem:[%s1280_s8 + $0x10] sm:$0xff] %vm33_vm6, %v559_v19 }
 0x158   :  { %582 = vst.msk [vmem:[%s1280_s8 + $0x40] sm:$0xff] %vm33_vm6, %v565_v62 }
 0x15b   :  { %v522_v27 = vpop.xlane.xlu2 %521 }
 0x15c   :  { %v563_v50 = vmin.f32 %v547_v20, %v522_v27 }
 0x15d   :  { %v530_v28 = vpop.xlane.xlu0 %529  ;;  %v512_v55 = vpop.xlane.xlu1 %511 }
 0x15e   :  { %v567_v46 = vmin.f32 %v551_v21, %v530_v28  ;;  %v558_v15 = vmin.f32 %v542_v23, %v512_v55  ;;  %580 = vst.msk [vmem:[%s1280_s8 + $0x30] sm:$0xff] %vm33_vm6, %v563_v50 }
 0x160   :  { %584 = vst.msk [vmem:[%s1280_s8 + $0x50] sm:$0xff] %vm33_vm6, %v567_v46 }
 0x161   :  { %575 = vst.msk [vmem:[%s1280_s8 + $0x8] sm:$0xff] %vm33_vm6, %v558_v15 }
 0x163   :  { %v516_v25 = vpop.xlane.xlu2 %515 }
 0x164   :  { %v560_v30 = vmin.f32 %v544_v58, %v516_v25 }
 0x165   :  { %v524_v32 = vpop.xlane.xlu0 %523  ;;  %v520_v44 = vpop.xlane.xlu1 %519 }
 0x166   :  { %v564_v37 = vmin.f32 %v548_v29, %v524_v32  ;;  %v562_v17 = vmin.f32 %v546_v26, %v520_v44  ;;  %577 = vst.msk [vmem:[%s1280_s8 + $0x18] sm:$0xff] %vm33_vm6, %v560_v30 }
 0x168   :  { %581 = vst.msk [vmem:[%s1280_s8 + $0x38] sm:$0xff] %vm33_vm6, %v564_v37 }
 0x169   :  { %579 = vst.msk [vmem:[%s1280_s8 + $0x28] sm:$0xff] %vm33_vm6, %v562_v17 }
 0x16b   :  { %v540_v63 = vpop.xlane.xlu2 %539 }
 0x16c   :  { %v572_v59 = vmin.f32 %v556_v34, %v540_v63 }
 0x16d   :  { %v536_v24 = vpop.xlane.xlu0 %535  ;;  %v532_v38 = vpop.xlane.xlu1 %531 }
 0x16e   :  { %v570_v35 = vmin.f32 %v554_v39, %v536_v24  ;;  %v568_v16 = vmin.f32 %v552_v40, %v532_v38  ;;  %589 = vst.msk [vmem:[%s1280_s8 + $0x78] sm:$0xff] %vm33_vm6, %v572_v59 }
 0x170   :  { %587 = vst.msk [vmem:[%s1280_s8 + $0x68] sm:$0xff] %vm33_vm6, %v570_v35 }
 0x171   :  { %585 = vst.msk [vmem:[%s1280_s8 + $0x58] sm:$0xff] %vm33_vm6, %v568_v16 }
 0x175   :  { %v538_v33 = vpop.xlane.xlu1 %537 }
 0x176   :  { %v571_v41 = vmin.f32 %v555_v7, %v538_v33 }
 0x178   :  { %588 = vst.msk [vmem:[%s1280_s8 + $0x70] sm:$0xff] %vm33_vm6, %v571_v41 }

</bundles_post_ra>
